<compile_context>
chip_gen: v6e
topology: v6e:2x2x1
jax: 0.10.0
libtpu: 0.0.40
codegen_flags: <defaults>
</compile_context>

<pallas_src>
import functools

import jax
import jax.numpy as jnp
from jax import lax
from jax.experimental import pallas as pl
from jax.experimental.pallas import tpu as pltpu


def _round_up(n, m):
    return ((n + m - 1) // m) * m


def _mlpcd_kernel(x_ref, w1_ref, b1_ref, w2_ref, b2_ref, w3_ref, b3_ref, o_ref):
    # fc1 (+ folded BN1) + ReLU.  f32 operands, f32 accumulation on the MXU.
    h1 = jnp.dot(x_ref[...], w1_ref[...],
                 preferred_element_type=jnp.float32) + b1_ref[...]
    h1 = jnp.maximum(h1, 0.0)

    # fc2 (+ folded BN2) + ReLU.
    h2 = jnp.dot(h1, w2_ref[...],
                 preferred_element_type=jnp.float32) + b2_ref[...]
    h2 = jnp.maximum(h2, 0.0)

    # final_fc, lane-dense: contract w3_rows (out_rows, hid2) with h2 (tile_m, hid2)
    # along their last dims (the q@k^T dot_general pattern) -> (out_rows, tile_m).
    # out_rows is tiny (8), so this is ~1 cheap MXU push per 256-lane batch chunk,
    # and the store is an unmasked full-lane row write.
    out_row = lax.dot_general(
        w3_ref[...], h2,
        dimension_numbers=(((1,), (1,)), ((), ())),
        preferred_element_type=jnp.float32)
    o_ref[...] = out_row + b3_ref[...]


@functools.lru_cache(maxsize=None)
def _build_call(batch, tile_m, num_tiles, in_size, hid1, hid2, out_rows):
    """Build (and cache) the pallas_call for one static configuration."""
    padded_b = num_tiles * tile_m

    flops = 2 * batch * (in_size * hid1 + hid1 * hid2 + hid2 * out_rows)
    bytes_accessed = (batch * in_size * 4                                   # x
                      + (in_size * hid1 + hid1 * hid2 + out_rows * hid2) * 4  # w1, w2, w3
                      + (hid1 + hid2 + out_rows) * 4                        # biases
                      + padded_b * out_rows * 4)                            # out

    return pl.pallas_call(
        _mlpcd_kernel,
        out_shape=jax.ShapeDtypeStruct((out_rows, padded_b), jnp.float32),
        grid=(num_tiles,),
        in_specs=[
            pl.BlockSpec((tile_m, in_size), lambda i: (i, 0)),   # x: streamed over batch
            pl.BlockSpec((in_size, hid1), lambda i: (0, 0)),     # w1 (VMEM-resident)
            pl.BlockSpec((1, hid1), lambda i: (0, 0)),           # b1
            pl.BlockSpec((hid1, hid2), lambda i: (0, 0)),        # w2
            pl.BlockSpec((1, hid2), lambda i: (0, 0)),           # b2
            pl.BlockSpec((out_rows, hid2), lambda i: (0, 0)),    # w3 rows (out_rows, hid2)
            pl.BlockSpec((out_rows, 1), lambda i: (0, 0)),       # b3 column
        ],
        # Lane-dense output: (out_rows, tile_m) row block, batch along lanes.
        out_specs=pl.BlockSpec((out_rows, tile_m), lambda i: (0, i)),
        compiler_params=pltpu.CompilerParams(
            # Batch tiles shard across v7x's 2 TensorCores; no-op on v5e/v6e.
            dimension_semantics=("parallel",),
            vmem_limit_bytes=32 * 1024 * 1024),
        cost_estimate=pl.CostEstimate(flops=flops, transcendentals=0,
                                      bytes_accessed=bytes_accessed),
    )


def _fold_bn(params, eps):
    """Fold eval-mode BatchNorm (running stats) into the preceding Linear layers."""
    (w1, b1, g1, be1, m1, v1,
     w2, b2, g2, be2, m2, v2,
     w3, b3) = params
    s1 = g1 * lax.rsqrt(v1 + eps)
    s2 = g2 * lax.rsqrt(v2 + eps)
    return (w1 * s1, (b1 - m1) * s1 + be1,
            w2 * s2, (b2 - m2) * s2 + be2,
            w3, b3)


def mlp_cd_forward(x, params, *, eps=1e-5, tile_m=None, use_pallas=None):
    """Forward for MlpCD (eval semantics). x: [B, 47] (or [47]) float32 -> [B, 1]."""
    if x.ndim == 1:
        x = x[None, :]
    if x.dtype != jnp.float32:
        x = x.astype(jnp.float32)
    B, in_size = x.shape

    w1, b1 = params[0], params[1]
    w2, b2 = params[6], params[7]
    w3, b3 = params[12], params[13]
    hid1, hid2, out_size = w1.shape[1], w2.shape[1], w3.shape[1]

    apply_bn = B > 1  # mirrors the PyTorch `x.shape[0] == 1` branch (static per shape)
    if apply_bn:
        w1c, b1c, w2c, b2c, w3c, b3c = _fold_bn(params, eps)
    else:
        w1c, b1c, w2c, b2c, w3c, b3c = w1, b1, w2, b2, w3, b3
    # dropout1/dropout2 are identity in eval mode.
    # TODO(synk): training-mode stochastic dropout / batch-stat BN not reproduced.

    if use_pallas is None:
        use_pallas = B > 256   # single tiny tile => plain XLA fusion wins
    if not use_pallas:
        h = jnp.maximum(x @ w1c + b1c, 0.0)
        h = jnp.maximum(h @ w2c + b2c, 0.0)
        return h @ w3c + b3c

    # Final layer as sublane-padded rows so every block is cleanly aligned and the
    # output is lane-dense (batch along lanes).
    out_rows = _round_up(out_size, 8)
    w3r = jnp.zeros((out_rows, hid2), jnp.float32).at[:out_size].set(w3c.T)
    b3r = jnp.zeros((out_rows, 1), jnp.float32).at[:out_size].set(b3c.T)

    # Tile selection: big tiles amortize the ~0.35us/step overhead; >=4 tiles keeps
    # both v7x TensorCores fed with a double-buffered pipeline; 4096 cap keeps the
    # per-tile VMEM (~10 MiB with x double buffers + h1/h2 temps) well under the
    # 32 MiB scoped limit (v7x physical VMEM is 64 MiB).  v5e could go larger.
    if tile_m is None:
        tile_m = min(4096, max(128, _round_up(pl.cdiv(B, 4), 128)))
    else:
        tile_m = max(1, int(tile_m))
    if tile_m >= B:
        tile_m = B                       # single whole-array tile
    else:
        tile_m = _round_up(tile_m, 128)  # multi-tile: lane dim of out block must be %128
        if tile_m >= B:
            tile_m = B
    num_tiles = pl.cdiv(B, tile_m)

    call = _build_call(B, tile_m, num_tiles, in_size, hid1, hid2, out_rows)
    out_t = call(x, w1c, b1c, w2c, b2c, w3r, b3r)     # (out_rows, num_tiles*tile_m)
    return out_t[:out_size, :B].T                     # (B, out_size)


def init_params(key, input_size=47, hidden_size1=128, hidden_size2=64, output_size=1):
    """Parameter init mimicking nn.Linear defaults; BN stats perturbed from the
    trivial defaults so the BN-folding path is actually exercised."""
    ks = jax.random.split(key, 14)

    def linear(kw, kb, fan_in, fan_out):
        bound = 1.0 / jnp.sqrt(jnp.float32(fan_in))
        w = jax.random.uniform(kw, (fan_in, fan_out), jnp.float32, -bound, bound)
        b = jax.random.uniform(kb, (1, fan_out), jnp.float32, -bound, bound)
        return w, b

    w1, b1 = linear(ks[0], ks[1], input_size, hidden_size1)
    w2, b2 = linear(ks[2], ks[3], hidden_size1, hidden_size2)
    w3, b3 = linear(ks[4], ks[5], hidden_size2, output_size)

    def bn(kg, kb2, km, kv, n):
        g = 1.0 + 0.1 * jax.random.normal(kg, (1, n), jnp.float32)
        be = 0.1 * jax.random.normal(kb2, (1, n), jnp.float32)
        m = 0.1 * jax.random.normal(km, (1, n), jnp.float32)
        v = 1.0 + 0.1 * jax.random.uniform(kv, (1, n), jnp.float32)
        return g, be, m, v

    g1, be1, m1, v1 = bn(ks[6], ks[7], ks[8], ks[9], hidden_size1)
    g2, be2, m2, v2 = bn(ks[10], ks[11], ks[12], ks[13], hidden_size2)

    return (w1, b1, g1, be1, m1, v1,
            w2, b2, g2, be2, m2, v2,
            w3, b3)


def _reference_forward(x, params, eps=1e-5):
    """Pure-JAX reference (eval-mode PyTorch semantics, unfolded BN)."""
    if x.ndim == 1:
        x = x[None, :]
    (w1, b1, g1, be1, m1, v1,
     w2, b2, g2, be2, m2, v2,
     w3, b3) = params
    apply_bn = x.shape[0] > 1

    h = x @ w1 + b1
    if apply_bn:
        h = (h - m1) / jnp.sqrt(v1 + eps) * g1 + be1
    h = jnp.maximum(h, 0.0)

    h = h @ w2 + b2
    if apply_bn:
        h = (h - m2) / jnp.sqrt(v2 + eps) * g2 + be2
    h = jnp.maximum(h, 0.0)

    return h @ w3 + b3


if __name__ == "__main__":
    key = jax.random.PRNGKey(0)
    k_params, k_x1, k_x2 = jax.random.split(key, 3)
    params = init_params(k_params)

    # Small batch (=2) forced through the Pallas kernel (BN folded into fc1/fc2).
    x_small = jax.random.normal(k_x1, (2, 47), jnp.float32)
    out = jax.block_until_ready(mlp_cd_forward(x_small, params, use_pallas=True))
    ref = _reference_forward(x_small, params)
    assert out.shape == (2, 1), out.shape
    assert jnp.allclose(out, ref, atol=1e-4, rtol=1e-4), (out, ref)

    # batch == 1 branch (BatchNorm skipped, as in the PyTorch forward).
    out1 = jax.block_until_ready(mlp_cd_forward(x_small[:1], params))
    ref1 = _reference_forward(x_small[:1], params)
    assert out1.shape == (1, 1)
    assert jnp.allclose(out1, ref1, atol=1e-4, rtol=1e-4), (out1, ref1)

    # Larger batch: multi-tile "parallel" grid with a partial last x tile and the
    # lane-dense (1, num_tiles*tile_m) output path.
    xb = jax.random.normal(k_x2, (640, 47), jnp.float32)
    outb = jax.block_until_ready(mlp_cd_forward(xb, params, tile_m=256))
    refb = _reference_forward(xb, params)
    assert outb.shape == (640, 1), outb.shape
    assert jnp.allclose(outb, refb, atol=1e-4, rtol=1e-4)

    # Default tiling heuristic (auto tile_m, auto kernel dispatch).
    outd = jax.block_until_ready(mlp_cd_forward(xb, params))
    assert jnp.allclose(outd, refb, atol=1e-4, rtol=1e-4)

    print("KERNEL_OK")
</pallas_src>

<mosaic_0001>
module attributes {stable_mosaic.version = 11 : i64} {
  func.func @_mlpcd_kernel(%arg0: i32, %arg1: memref<2x47xf32, #tpu.memory_space<vmem>>, %arg2: memref<47x128xf32, #tpu.memory_space<vmem>>, %arg3: memref<1x128xf32, #tpu.memory_space<vmem>>, %arg4: memref<128x64xf32, #tpu.memory_space<vmem>>, %arg5: memref<1x64xf32, #tpu.memory_space<vmem>>, %arg6: memref<8x64xf32, #tpu.memory_space<vmem>>, %arg7: memref<8x1xf32, #tpu.memory_space<vmem>>, %arg8: memref<8x2xf32, #tpu.memory_space<vmem>>) attributes {dimension_semantics = [#tpu.dimension_semantics<parallel>], iteration_bounds = array<i64: 1>, scalar_prefetch = 0 : i64, scratch_operands = 0 : i64, tpu.core_type = #tpu.core_type<tc>, window_params = [{transform_indices = @transform_0, window_bounds = array<i64: 2, 47>}, {pipeline_mode = #tpu.pipeline_mode<synchronous>, transform_indices = @transform_1, window_bounds = array<i64: 47, 128>}, {pipeline_mode = #tpu.pipeline_mode<synchronous>, transform_indices = @transform_2, window_bounds = array<i64: 1, 128>}, {pipeline_mode = #tpu.pipeline_mode<synchronous>, transform_indices = @transform_3, window_bounds = array<i64: 128, 64>}, {pipeline_mode = #tpu.pipeline_mode<synchronous>, transform_indices = @transform_4, window_bounds = array<i64: 1, 64>}, {pipeline_mode = #tpu.pipeline_mode<synchronous>, transform_indices = @transform_5, window_bounds = array<i64: 8, 64>}, {pipeline_mode = #tpu.pipeline_mode<synchronous>, transform_indices = @transform_6, window_bounds = array<i64: 8, 1>}, {transform_indices = @transform_7, window_bounds = array<i64: 8, 2>}]} {
    %c0 = arith.constant 0 : index
    %c0_0 = arith.constant 0 : index
    %0 = vector.load %arg1[%c0, %c0_0] : memref<2x47xf32, #tpu.memory_space<vmem>>, vector<2x47xf32>
    %c0_1 = arith.constant 0 : index
    %c0_2 = arith.constant 0 : index
    %1 = vector.load %arg2[%c0_1, %c0_2] : memref<47x128xf32, #tpu.memory_space<vmem>>, vector<47x128xf32>
    %cst = arith.constant dense<0.000000e+00> : vector<2x128xf32>
    %2 = tpu.matmul %0, %1, %cst {dimension_numbers = #tpu.dot_dimension_numbers<[1], [0], [0], [1], [0, 0, 1, 1], [], []>} : vector<2x47xf32>, vector<47x128xf32>, vector<2x128xf32> -> vector<2x128xf32>
    %c0_3 = arith.constant 0 : index
    %c0_4 = arith.constant 0 : index
    %3 = vector.load %arg3[%c0_3, %c0_4] : memref<1x128xf32, #tpu.memory_space<vmem>>, vector<1x128xf32>
    %4 = vector.broadcast %3 : vector<1x128xf32> to vector<2x128xf32>
    %5 = arith.addf %2, %4 : vector<2x128xf32>
    %cst_5 = arith.constant 0.000000e+00 : f32
    %6 = vector.broadcast %cst_5 : f32 to vector<2x128xf32>
    %7 = arith.maximumf %5, %6 : vector<2x128xf32>
    %c0_6 = arith.constant 0 : index
    %c0_7 = arith.constant 0 : index
    %8 = vector.load %arg4[%c0_6, %c0_7] : memref<128x64xf32, #tpu.memory_space<vmem>>, vector<128x64xf32>
    %cst_8 = arith.constant dense<0.000000e+00> : vector<2x64xf32>
    %9 = tpu.matmul %7, %8, %cst_8 {dimension_numbers = #tpu.dot_dimension_numbers<[1], [0], [0], [1], [0, 0, 1, 1], [], []>} : vector<2x128xf32>, vector<128x64xf32>, vector<2x64xf32> -> vector<2x64xf32>
    %c0_9 = arith.constant 0 : index
    %c0_10 = arith.constant 0 : index
    %10 = vector.load %arg5[%c0_9, %c0_10] : memref<1x64xf32, #tpu.memory_space<vmem>>, vector<1x64xf32>
    %11 = vector.broadcast %10 : vector<1x64xf32> to vector<2x64xf32>
    %12 = arith.addf %9, %11 : vector<2x64xf32>
    %cst_11 = arith.constant 0.000000e+00 : f32
    %13 = vector.broadcast %cst_11 : f32 to vector<2x64xf32>
    %14 = arith.maximumf %12, %13 : vector<2x64xf32>
    %c0_12 = arith.constant 0 : index
    %c0_13 = arith.constant 0 : index
    %15 = vector.load %arg6[%c0_12, %c0_13] : memref<8x64xf32, #tpu.memory_space<vmem>>, vector<8x64xf32>
    %cst_14 = arith.constant dense<0.000000e+00> : vector<8x2xf32>
    %16 = tpu.matmul %15, %14, %cst_14 {dimension_numbers = #tpu.dot_dimension_numbers<[1], [1], [0], [0], [0, 0, 1, 0], [], []>} : vector<8x64xf32>, vector<2x64xf32>, vector<8x2xf32> -> vector<8x2xf32>
    %c0_15 = arith.constant 0 : index
    %c0_16 = arith.constant 0 : index
    %17 = vector.load %arg7[%c0_15, %c0_16] : memref<8x1xf32, #tpu.memory_space<vmem>>, vector<8x1xf32>
    %18 = vector.broadcast %17 : vector<8x1xf32> to vector<8x2xf32>
    %19 = arith.addf %16, %18 : vector<8x2xf32>
    %c0_17 = arith.constant 0 : index
    %c0_18 = arith.constant 0 : index
    %20 = vector.load %arg8[%c0_17, %c0_18] : memref<8x2xf32, #tpu.memory_space<vmem>>, vector<8x2xf32>
    tpu.vector_store %arg8[%c0_17, %c0_18], %19 {strides = array<i32>} : memref<8x2xf32, #tpu.memory_space<vmem>>, vector<8x2xf32>,
    return
  }
  func.func @transform_0(%arg0: i32) -> (i32, i32) {
    %c0_i32 = arith.constant 0 : i32
    %c0_i32_0 = arith.constant 0 : i32
    return %arg0, %c0_i32 : i32, i32
  }
  func.func @transform_1(%arg0: i32) -> (i32, i32) {
    %c0_i32 = arith.constant 0 : i32
    %c0_i32_0 = arith.constant 0 : i32
    %c0_i32_1 = arith.constant 0 : i32
    return %c0_i32, %c0_i32_0 : i32, i32
  }
  func.func @transform_2(%arg0: i32) -> (i32, i32) {
    %c0_i32 = arith.constant 0 : i32
    %c0_i32_0 = arith.constant 0 : i32
    %c0_i32_1 = arith.constant 0 : i32
    return %c0_i32, %c0_i32_0 : i32, i32
  }
  func.func @transform_3(%arg0: i32) -> (i32, i32) {
    %c0_i32 = arith.constant 0 : i32
    %c0_i32_0 = arith.constant 0 : i32
    %c0_i32_1 = arith.constant 0 : i32
    return %c0_i32, %c0_i32_0 : i32, i32
  }
  func.func @transform_4(%arg0: i32) -> (i32, i32) {
    %c0_i32 = arith.constant 0 : i32
    %c0_i32_0 = arith.constant 0 : i32
    %c0_i32_1 = arith.constant 0 : i32
    return %c0_i32, %c0_i32_0 : i32, i32
  }
  func.func @transform_5(%arg0: i32) -> (i32, i32) {
    %c0_i32 = arith.constant 0 : i32
    %c0_i32_0 = arith.constant 0 : i32
    %c0_i32_1 = arith.constant 0 : i32
    return %c0_i32, %c0_i32_0 : i32, i32
  }
  func.func @transform_6(%arg0: i32) -> (i32, i32) {
    %c0_i32 = arith.constant 0 : i32
    %c0_i32_0 = arith.constant 0 : i32
    %c0_i32_1 = arith.constant 0 : i32
    return %c0_i32, %c0_i32_0 : i32, i32
  }
  func.func @transform_7(%arg0: i32) -> (i32, i32) {
    %c0_i32 = arith.constant 0 : i32
    %c0_i32_0 = arith.constant 0 : i32
    return %c0_i32, %arg0 : i32, i32
  }
}

</mosaic_0001>

<bundles_post_ra>
// kernel: tpu_custom_call.1
= control target key start
LH: loop header
LB: loop body
LE: loop exit
PB: predicated region body
PF: predicated region fallthrough
CT: control target
= control target key end

     0   :  { %vm44_vm0 = vcmask 1046528   ;;  %v394_v0 = vmov 0.0   ;;  %vm395_vm1 = vmmov 0   ;;  %vm40_vm2 = vcmask 384000   ;;  %s550_s1 = inlined_call_operand.vmem [shape: f32[47,128], index: 1, kind: input, shape index: {}]   ;;  %s551_s3 = inlined_call_operand.vmem [shape: f32[128,64], index: 3, kind: input, shape index: {}]   ;;  %s552_s0 = inlined_call_operand.vmem [shape: f32[2,47], index: 0, kind: input, shape index: {}]   ;;  %s553_s2 = inlined_call_operand.vmem [shape: f32[1,128], index: 2, kind: input, shape index: {}]   ;;  %s554_s6 = inlined_call_operand.vmem [shape: f32[8,1], index: 6, kind: input, shape index: {}]   ;;  %s555_s4 = inlined_call_operand.vmem [shape: f32[1,64], index: 4, kind: input, shape index: {}]   ;;  %s556_s5 = inlined_call_operand.vmem [shape: f32[8,64], index: 5, kind: input, shape index: {}]   ;;  %s557_s7 = inlined_call_operand.vmem [shape: f32[8,2], index: 7, kind: output, shape index: {}]  }
   0x1   :  { %335 = vmatprep.subr.mxu0 %v394_v0  ;;  %v32_v1 = vld [vmem:[%s550_s1 + $0x28] sm:$0x7f]  ;;  %v31_v2 = vld [vmem:[%s550_s1 + $0x20] sm:$0xff]  ;;  %347 = vmatprep.mubr.msk.f32.mxu0 %vm395_vm1, %v394_v0  ;;  %v30_v3 = vld [vmem:[%s550_s1 + $0x18] sm:$0xff]  ;;  %v396_v29 = vmov 0   ;;  %vm220_vm3 = vcmask 523264  }
   0x2   :  { %336 = vmatpush3.msk.msra.mxu0 %vm44_vm0, %v32_v1  ;;  %350 = vmatprep.subr.mxu1 %v394_v0  ;;  %v134_v4 = vld [vmem:[%s551_s3 + $0x78] sm:$0xff]  ;;  %v133_v5 = vld [vmem:[%s551_s3 + $0x70] sm:$0xff]  ;;  %v132_v7 = vld [vmem:[%s551_s3 + $0x68] sm:$0xff]  ;;  %vm297_vm4 = vcmask 15360  }
   0x3   :  { %337 = vmatprep.subr.mxu0 %v394_v0  ;;  %382 = vmatprep.mubr.msk.f32.mxu1 %vm395_vm1, %v394_v0  ;;  %v29_v6 = vld [vmem:[%s550_s1 + $0x10] sm:$0xff]  ;;  %v28_v8 = vld [vmem:[%s550_s1 + $0x8] sm:$0xff]  ;;  %v131_v9 = vld [vmem:[%s551_s3 + $0x60] sm:$0xff] }
   0x4   :  { %338 = vmatpush3.msra.mxu0 %v31_v2  ;;  %351 = vmatpush3.msra.mxu1 %v134_v4  ;;  %v27_v10 = vld [vmem:[%s550_s1] sm:$0xff]  ;;  %v130_v11 = vld [vmem:[%s551_s3 + $0x58] sm:$0xff]  ;;  %v129_v13 = vld [vmem:[%s551_s3 + $0x50] sm:$0xff] }
   0x5   :  { %339 = vmatprep.subr.mxu0 %v394_v0  ;;  %352 = vmatprep.subr.mxu1 %v394_v0  ;;  %v26_v12 = vld [vmem:[%s552_s0] sm:$0x3]  ;;  %v128_v14 = vld [vmem:[%s551_s3 + $0x48] sm:$0xff]  ;;  %v126_v16 = vld [vmem:[%s551_s3 + $0x38] sm:$0xff] }
   0x6   :  { %340 = vmatpush3.msra.mxu0 %v30_v3  ;;  %353 = vmatpush3.msra.mxu1 %v133_v5  ;;  %v127_v15 = vld [vmem:[%s551_s3 + $0x40] sm:$0xff]  ;;  %v125_v17 = vld [vmem:[%s551_s3 + $0x30] sm:$0xff]  ;;  %v124_v18 = vld [vmem:[%s551_s3 + $0x28] sm:$0xff] }
   0x7   :  { %341 = vmatprep.subr.mxu0 %v394_v0  ;;  %354 = vmatprep.subr.mxu1 %v394_v0  ;;  %v123_v19 = vld [vmem:[%s551_s3 + $0x20] sm:$0xff]  ;;  %v122_v20 = vld [vmem:[%s551_s3 + $0x18] sm:$0xff]  ;;  %v121_v21 = vld [vmem:[%s551_s3 + $0x10] sm:$0xff] }
   0x8   :  { %342 = vmatpush3.msra.mxu0 %v29_v6  ;;  %355 = vmatpush3.msra.mxu1 %v132_v7  ;;  %v120_v22 = vld [vmem:[%s551_s3 + $0x8] sm:$0xff]  ;;  %v119_v23 = vld [vmem:[%s551_s3] sm:$0xff] }
   0x9   :  { %343 = vmatprep.subr.mxu0 %v394_v0  ;;  %356 = vmatprep.subr.mxu1 %v394_v0  ;;  %v303_v24 = vld [vmem:[%s553_s2] ss:$0 sm:$0xff] }
   0xa   :  { %344 = vmatpush3.msra.mxu0 %v28_v8  ;;  %357 = vmatpush3.msra.mxu1 %v131_v9  ;;  %v214_v30 = vld [vmem:[%s554_s6] sm:$0xff] }
   0xb   :  { %345 = vmatprep.subr.mxu0 %v394_v0  ;;  %358 = vmatprep.subr.mxu1 %v394_v0  ;;  %v306_v31 = vld [vmem:[%s555_s4] ss:$0 sm:$0xff] }
   0xc   :  { %346 = vmatpush3.msra.mxu0 %v27_v10  ;;  %359 = vmatpush3.msra.mxu1 %v130_v11  ;;  %v213_v36 = vld [vmem:[%s556_s5] sm:$0xff] }
   0xd   :  { %348 = vmatmul.mubr.msk.f32.vlgmr.msra.gmra.mxu0 %vm40_vm2, %v26_v12  ;;  %360 = vmatprep.subr.mxu1 %v394_v0 }
   0xe   :  { %361 = vmatpush3.msra.mxu1 %v129_v13  ;;  %385 = vmatprep.subr.mxu0 %v394_v0 }
   0xf   :  { %362 = vmatprep.subr.mxu1 %v394_v0  ;;  %387 = vmatprep.mubr.msk.f32.mxu0 %vm395_vm1, %v394_v0 }
  0x10   :  { %363 = vmatpush3.msra.mxu1 %v128_v14  ;;  %393 = vset.pattern.permute.xlu0 %v396_v29 }
  0x11   :  { %364 = vmatprep.subr.mxu1 %v394_v0  ;;  %217 = vperm.xlu0 %393, %v214_v30  }
  0x12   :  { %365 = vmatpush3.msra.mxu1 %v127_v15 }
  0x13   :  { %366 = vmatprep.subr.mxu1 %v394_v0 }
  0x14   :  { %367 = vmatpush3.msra.mxu1 %v126_v16 }
  0x15   :  { %368 = vmatprep.subr.mxu1 %v394_v0 }
  0x16   :  { %369 = vmatpush3.msra.mxu1 %v125_v17 }
  0x17   :  { %370 = vmatprep.subr.mxu1 %v394_v0 }
  0x18   :  { %371 = vmatpush3.msra.mxu1 %v124_v18 }
  0x19   :  { %372 = vmatprep.subr.mxu1 %v394_v0 }
  0x1a   :  { %373 = vmatpush3.msra.mxu1 %v123_v19 }
  0x1b   :  { %374 = vmatprep.subr.mxu1 %v394_v0 }
  0x1c   :  { %375 = vmatpush3.msra.mxu1 %v122_v20 }
  0x1d   :  { %376 = vmatprep.subr.mxu1 %v394_v0 }
  0x1e   :  { %377 = vmatpush3.msra.mxu1 %v121_v21 }
  0x1f   :  { %378 = vmatprep.subr.mxu1 %v394_v0 }
  0x20   :  { %379 = vmatpush3.msra.mxu1 %v120_v22 }
  0x21   :  { %380 = vmatprep.subr.mxu1 %v394_v0 }
  0x22   :  { %381 = vmatpush3.msra.mxu1 %v119_v23 }
  0x8c   :  { %v218_v37 = vpop.permute.xlu0 %217 }
  0xcd   :  { %v114_v25 = vpop.f32.mrf.mxu0 }
  0xce   :  { %v115_v26 = vadd.f32 %v303_v24, %v114_v25 }
  0xcf   :  { %v349_v27 = vpop.f32.mrf.mxu0 }
  0xd0   :  { %v118_v28 = vmax.f32 %v115_v26, 0.0 }
  0xd2   :  { %383 = vmatmul.mubr.f32.vlgmr.msra.gmra.mxu1 %v118_v28 }
 0x192   :  { %v208_v32 = vpop.f32.mrf.mxu1 }
 0x193   :  { %v209_v33 = vadd.f32 %v306_v31, %v208_v32 }
 0x194   :  { %v384_v34 = vpop.f32.mrf.mxu1 }
 0x195   :  { %v212_v35 = vmax.f32 %v209_v33, 0.0 }
 0x197   :  { %386 = vmatpush3.xpose.msk.msra.mxu0 %vm220_vm3, %v212_v35 }
 0x19a   :  { %388 = vmatmul.mubr.msk.f32.vlgmr.msra.gmra.mxu0 %vm220_vm3, %v213_v36 }
 0x25a   :  { %v293_v38 = vpop.f32.mrf.mxu0 }
 0x25b   :  { %v294_v39 = vadd.f32 %v293_v38, %v218_v37 }
 0x25c   :  { %v389_v40 = vpop.f32.mrf.mxu0 }
 0x25d   :  { %298 = vst.msk [vmem:[%s557_s7] sm:$0xff] %vm297_vm4, %v294_v39 }

</bundles_post_ra>
